<compile_context>
chip_gen: v7x
topology: tpu7x:2x2x1
jax: 0.10.0
libtpu: 0.0.40
codegen_flags: <defaults>
</compile_context>

<pallas_src>
import numpy as np

import jax
import jax.numpy as jnp
from jax.experimental import pallas as pl
from jax.experimental.pallas import tpu as pltpu


# --------------------------------------------------------------------------
# Kernel
# --------------------------------------------------------------------------
def _mish_fast(h):
    """mish(h) = h * tanh(softplus(h)) with one exp + one approx reciprocal.

    tanh(softplus(h)) = (e^2 + 2e) / (e^2 + 2e + 2), e = exp(h); for h > 20
    the factor is 1 to machine precision, so mish(h) ~= h.
    """
    e = jnp.exp(jnp.minimum(h, 20.0))
    n = e * e + 2.0 * e
    t = n * pl.reciprocal(n + 2.0, approx=True)
    return h * jnp.where(h > 20.0, 1.0, t)


def _mlp_kernel(x_ref, w1_ref, b1_ref, w2_ref, b2_ref, o_ref):
    # One (tile_b, in_size) row tile of x -> one (tile_b, out_size) tile of y.
    # Both dots accumulate in f32 on the MXU regardless of compute dtype.
    h = jnp.dot(x_ref[...], w1_ref[...], preferred_element_type=jnp.float32)
    h = h + b1_ref[...]                      # bias add + mish in f32 (VPU/EUP)
    h = _mish_fast(h)
    y = jnp.dot(h.astype(w2_ref.dtype), w2_ref[...],
                preferred_element_type=jnp.float32)
    y = y + b2_ref[...]
    o_ref[...] = y.astype(o_ref.dtype)


# --------------------------------------------------------------------------
# Wrapper helpers
# --------------------------------------------------------------------------
def _round_up(x, m):
    return ((x + m - 1) // m) * m


def _vmem_budget():
    """~70% of physical VMEM: ~90 MiB on v5e/v6e, ~45 MiB on v7x."""
    try:
        cap = pltpu.get_tpu_info().vmem_capacity_bytes
    except Exception:
        cap = 64 << 20                       # conservative fallback (v7x/TC)
    return int(cap * 0.70)


def _pick_tile_b(batch, in_size, out_size, compute_bytes, out_bytes, budget,
                 weight_buffers):
    """Largest multiple-of-8 row tile whose full VMEM footprint fits budget."""
    # Resident operands: W1^T, W2^T (compute dtype) + biases (f32), held in
    # `weight_buffers` copies (1 if single-buffered via pl.Buffered(1)).
    weight_bytes = weight_buffers * (
        (in_size * in_size + in_size * out_size) * compute_bytes
        + (in_size + out_size) * 4)
    avail = budget - weight_bytes
    if avail <= 0:
        # TODO(synk): K/N-tiled accumulator fallback for huge hidden dims.
        avail = budget // 4
    # Per batch row: double-buffered x tile + double-buffered out tile
    # + hidden h (f32) + ~2x f32 mish temporaries.
    per_row = (2 * in_size * compute_bytes
               + 2 * out_size * out_bytes
               + 3 * in_size * 4)
    max_rows = max((avail // per_row) // 8 * 8, 8)
    rows8 = _round_up(batch, 8)
    tile = min(rows8, 2048, max_rows)
    # >= 2 grid steps when possible so v7x's two TensorCores both get work
    # under dimension_semantics=("parallel",); neutral on v5e/v6e (1 TC).
    if rows8 >= 16:
        tile = min(tile, _round_up(rows8 // 2, 8))
    return max((tile // 8) * 8, 8)


def _run_pallas(xc, w1c, b1_2d, w2c, b2_2d, *, tile_b, out_dtype, vmem_limit,
                single_buffer_weights):
    batch, in_size = xc.shape
    out_size = w2c.shape[1]
    grid = (pl.cdiv(batch, tile_b),)

    if single_buffer_weights:
        # Constant-index operands: one VMEM buffer instead of the default two.
        def res(shape):
            return pl.BlockSpec(shape, lambda i: (0, 0),
                                pipeline_mode=pl.Buffered(1))
    else:
        def res(shape):
            return pl.BlockSpec(shape, lambda i: (0, 0))

    return pl.pallas_call(
        _mlp_kernel,
        out_shape=jax.ShapeDtypeStruct((batch, out_size), out_dtype),
        grid_spec=pltpu.PrefetchScalarGridSpec(
            num_scalar_prefetch=0,
            grid=grid,
            in_specs=[
                pl.BlockSpec((tile_b, in_size), lambda i: (i, 0)),   # x rows
                res((in_size, in_size)),                             # W1^T
                res((1, in_size)),                                   # b1
                res((in_size, out_size)),                            # W2^T
                res((1, out_size)),                                  # b2
            ],
            out_specs=pl.BlockSpec((tile_b, out_size), lambda i: (i, 0)),
        ),
        compiler_params=pltpu.CompilerParams(
            dimension_semantics=("parallel",),
            vmem_limit_bytes=int(vmem_limit),
        ),
    )(xc, w1c, b1_2d, w2c, b2_2d)


# Cached: does pl.Buffered(1) lower on this jax/TPU combination?
_SINGLE_BUFFER_WEIGHTS_OK = None


def mlp_forward(x, w1_t, b1, w2_t, b2, *, compute_dtype=jnp.bfloat16,
                tile_b=None):
    """Fused MLP: mish(x @ w1_t + b1) @ w2_t + b2.

    w1_t: (input_size, input_size)  -- torch weight already transposed
    w2_t: (input_size, output_size) -- torch weight already transposed
    Matmuls run in `compute_dtype` with f32 accumulation; output dtype == x.
    """
    global _SINGLE_BUFFER_WEIGHTS_OK

    batch, in_size = x.shape
    out_size = w2_t.shape[1]
    out_dtype = x.dtype

    # Lane-dense output: pad output features to a multiple of 128 so stores
    # are unmasked vst (zero cost when already aligned, as for 128/256/...).
    padded_out = _round_up(out_size, 128)
    if padded_out != out_size:
        w2_t = jnp.pad(w2_t, ((0, 0), (0, padded_out - out_size)))
        b2 = jnp.pad(b2, (0, padded_out - out_size))
    # TODO(synk): padding in_size to a multiple of 128 would also help, but it
    # requires materializing a padded copy of x; only worth it upstream.

    compute_bytes = np.dtype(compute_dtype).itemsize
    out_bytes = np.dtype(out_dtype).itemsize
    budget = _vmem_budget()

    single_buf_guess = _SINGLE_BUFFER_WEIGHTS_OK is not False
    if tile_b is None:
        tile_b = _pick_tile_b(batch, in_size, padded_out, compute_bytes,
                              out_bytes, budget,
                              weight_buffers=1 if single_buf_guess else 2)
    tile_b = max((int(tile_b) // 8) * 8, 8)

    xc = x.astype(compute_dtype)
    w1c = w1_t.astype(compute_dtype)
    w2c = w2_t.astype(compute_dtype)
    b1_2d = b1.reshape(1, in_size).astype(jnp.float32)
    b2_2d = b2.reshape(1, padded_out).astype(jnp.float32)

    kwargs = dict(tile_b=tile_b, out_dtype=out_dtype, vmem_limit=budget)
    if _SINGLE_BUFFER_WEIGHTS_OK is None:
        try:
            out = jax.block_until_ready(
                _run_pallas(xc, w1c, b1_2d, w2c, b2_2d,
                            single_buffer_weights=True, **kwargs))
            _SINGLE_BUFFER_WEIGHTS_OK = True
        except Exception:
            _SINGLE_BUFFER_WEIGHTS_OK = False
            out = _run_pallas(xc, w1c, b1_2d, w2c, b2_2d,
                              single_buffer_weights=False, **kwargs)
    else:
        out = _run_pallas(xc, w1c, b1_2d, w2c, b2_2d,
                          single_buffer_weights=_SINGLE_BUFFER_WEIGHTS_OK,
                          **kwargs)

    return out if padded_out == out_size else out[:, :out_size]


# --------------------------------------------------------------------------
# Pure-JAX reference (exact mish; mirrors torch Linear -> mish -> Linear)
# --------------------------------------------------------------------------
def mlp_reference(x, w1, b1, w2, b2):
    h = x @ w1.T + b1
    h = h * jnp.tanh(jax.nn.softplus(h))
    return h @ w2.T + b2


# --------------------------------------------------------------------------
# Demo / smoke test
# --------------------------------------------------------------------------
if __name__ == "__main__":
    key = jax.random.PRNGKey(0)
    batch, input_size, output_size = 16, 128, 128

    k_x, k_w1, k_b1, k_w2, k_b2 = jax.random.split(key, 5)
    # PyTorch-style parameter layout: weight is (out_features, in_features).
    x = jax.random.normal(k_x, (batch, input_size), dtype=jnp.float32)
    w1 = jax.random.normal(k_w1, (input_size, input_size), jnp.float32) * 0.05
    b1 = jax.random.normal(k_b1, (input_size,), jnp.float32) * 0.05
    w2 = jax.random.normal(k_w2, (output_size, input_size), jnp.float32) * 0.05
    b2 = jax.random.normal(k_b2, (output_size,), jnp.float32) * 0.05

    y_ref = jax.block_until_ready(mlp_reference(x, w1, b1, w2, b2))

    # f32 MXU path: only the fast-mish approximation differs from reference.
    y32 = jax.block_until_ready(
        mlp_forward(x, w1.T, b1, w2.T, b2, compute_dtype=jnp.float32))
    assert y32.shape == (batch, output_size)
    assert y32.dtype == jnp.float32
    assert jnp.allclose(y32, y_ref, rtol=2e-2, atol=2e-2), (
        f"f32 max abs err = {float(jnp.max(jnp.abs(y32 - y_ref)))}")

    # Default bf16 MXU path (f32 accumulation): loosened tolerance.
    ybf = jax.block_until_ready(mlp_forward(x, w1.T, b1, w2.T, b2))
    assert ybf.shape == (batch, output_size)
    assert ybf.dtype == jnp.float32
    assert jnp.allclose(ybf, y_ref, rtol=5e-2, atol=5e-2), (
        f"bf16 max abs err = {float(jnp.max(jnp.abs(ybf - y_ref)))}")

    print("KERNEL_OK")
</pallas_src>

<mosaic_0001>
module attributes {stable_mosaic.version = 11 : i64} {
  func.func @_mlp_kernel(%arg0: i32, %arg1: memref<8x128xf32, #tpu.memory_space<vmem>>, %arg2: memref<128x128xf32, #tpu.memory_space<vmem>>, %arg3: memref<1x128xf32, #tpu.memory_space<vmem>>, %arg4: memref<128x128xf32, #tpu.memory_space<vmem>>, %arg5: memref<1x128xf32, #tpu.memory_space<vmem>>, %arg6: memref<8x128xf32, #tpu.memory_space<vmem>>) attributes {dimension_semantics = [#tpu.dimension_semantics<parallel>], iteration_bounds = array<i64: 2>, scalar_prefetch = 0 : i64, scratch_operands = 0 : i64, tpu.core_type = #tpu.core_type<tc>, window_params = [{transform_indices = @transform_0, window_bounds = array<i64: 8, 128>}, {pipeline_mode = #tpu.pipeline_mode<synchronous>, transform_indices = @transform_1, window_bounds = array<i64: 128, 128>}, {pipeline_mode = #tpu.pipeline_mode<synchronous>, transform_indices = @transform_2, window_bounds = array<i64: 1, 128>}, {pipeline_mode = #tpu.pipeline_mode<synchronous>, transform_indices = @transform_3, window_bounds = array<i64: 128, 128>}, {pipeline_mode = #tpu.pipeline_mode<synchronous>, transform_indices = @transform_4, window_bounds = array<i64: 1, 128>}, {transform_indices = @transform_5, window_bounds = array<i64: 8, 128>}]} {
    %c0 = arith.constant 0 : index
    %c0_0 = arith.constant 0 : index
    %0 = vector.load %arg1[%c0, %c0_0] : memref<8x128xf32, #tpu.memory_space<vmem>>, vector<8x128xf32>
    %c0_1 = arith.constant 0 : index
    %c0_2 = arith.constant 0 : index
    %1 = vector.load %arg2[%c0_1, %c0_2] : memref<128x128xf32, #tpu.memory_space<vmem>>, vector<128x128xf32>
    %cst = arith.constant dense<0.000000e+00> : vector<8x128xf32>
    %2 = tpu.matmul %0, %1, %cst {dimension_numbers = #tpu.dot_dimension_numbers<[1], [0], [0], [1], [0, 0, 1, 1], [], []>} : vector<8x128xf32>, vector<128x128xf32>, vector<8x128xf32> -> vector<8x128xf32>
    %c0_3 = arith.constant 0 : index
    %c0_4 = arith.constant 0 : index
    %3 = vector.load %arg3[%c0_3, %c0_4] : memref<1x128xf32, #tpu.memory_space<vmem>>, vector<1x128xf32>
    %4 = vector.broadcast %3 : vector<1x128xf32> to vector<8x128xf32>
    %5 = arith.addf %2, %4 : vector<8x128xf32>
    %cst_5 = arith.constant 2.000000e+01 : f32
    %6 = vector.broadcast %cst_5 : f32 to vector<8x128xf32>
    %7 = arith.minimumf %5, %6 : vector<8x128xf32>
    %8 = math.exp %7 : vector<8x128xf32>
    %9 = arith.mulf %8, %8 : vector<8x128xf32>
    %cst_6 = arith.constant 2.000000e+00 : f32
    %10 = vector.broadcast %cst_6 : f32 to vector<8x128xf32>
    %11 = arith.mulf %10, %8 : vector<8x128xf32>
    %12 = arith.addf %9, %11 : vector<8x128xf32>
    %cst_7 = arith.constant 2.000000e+00 : f32
    %13 = vector.broadcast %cst_7 : f32 to vector<8x128xf32>
    %14 = arith.addf %12, %13 : vector<8x128xf32>
    %15 = tpu.reciprocal %14 {approx = true} : vector<8x128xf32> -> vector<8x128xf32>
    %16 = arith.mulf %12, %15 : vector<8x128xf32>
    %cst_8 = arith.constant 2.000000e+01 : f32
    %17 = vector.broadcast %cst_8 : f32 to vector<8x128xf32>
    %18 = arith.cmpf ogt, %5, %17 : vector<8x128xf32>
    %cst_9 = arith.constant 1.000000e+00 : f32
    %19 = vector.broadcast %cst_9 : f32 to vector<8x128xf32>
    %20 = arith.select %18, %19, %16 : vector<8x128xi1>, vector<8x128xf32>
    %21 = arith.mulf %5, %20 : vector<8x128xf32>
    %c0_10 = arith.constant 0 : index
    %c0_11 = arith.constant 0 : index
    %22 = vector.load %arg4[%c0_10, %c0_11] : memref<128x128xf32, #tpu.memory_space<vmem>>, vector<128x128xf32>
    %cst_12 = arith.constant dense<0.000000e+00> : vector<8x128xf32>
    %23 = tpu.matmul %21, %22, %cst_12 {dimension_numbers = #tpu.dot_dimension_numbers<[1], [0], [0], [1], [0, 0, 1, 1], [], []>} : vector<8x128xf32>, vector<128x128xf32>, vector<8x128xf32> -> vector<8x128xf32>
    %c0_13 = arith.constant 0 : index
    %c0_14 = arith.constant 0 : index
    %24 = vector.load %arg5[%c0_13, %c0_14] : memref<1x128xf32, #tpu.memory_space<vmem>>, vector<1x128xf32>
    %25 = vector.broadcast %24 : vector<1x128xf32> to vector<8x128xf32>
    %26 = arith.addf %23, %25 : vector<8x128xf32>
    %c0_15 = arith.constant 0 : index
    %c0_16 = arith.constant 0 : index
    %27 = vector.load %arg6[%c0_15, %c0_16] : memref<8x128xf32, #tpu.memory_space<vmem>>, vector<8x128xf32>
    tpu.vector_store %arg6[%c0_15, %c0_16], %26 {strides = array<i32>} : memref<8x128xf32, #tpu.memory_space<vmem>>, vector<8x128xf32>,
    return
  }
  func.func @transform_0(%arg0: i32) -> (i32, i32) {
    %c0_i32 = arith.constant 0 : i32
    %c0_i32_0 = arith.constant 0 : i32
    return %arg0, %c0_i32 : i32, i32
  }
  func.func @transform_1(%arg0: i32) -> (i32, i32) {
    %c0_i32 = arith.constant 0 : i32
    %c0_i32_0 = arith.constant 0 : i32
    %c0_i32_1 = arith.constant 0 : i32
    return %c0_i32, %c0_i32_0 : i32, i32
  }
  func.func @transform_2(%arg0: i32) -> (i32, i32) {
    %c0_i32 = arith.constant 0 : i32
    %c0_i32_0 = arith.constant 0 : i32
    %c0_i32_1 = arith.constant 0 : i32
    return %c0_i32, %c0_i32_0 : i32, i32
  }
  func.func @transform_3(%arg0: i32) -> (i32, i32) {
    %c0_i32 = arith.constant 0 : i32
    %c0_i32_0 = arith.constant 0 : i32
    %c0_i32_1 = arith.constant 0 : i32
    return %c0_i32, %c0_i32_0 : i32, i32
  }
  func.func @transform_4(%arg0: i32) -> (i32, i32) {
    %c0_i32 = arith.constant 0 : i32
    %c0_i32_0 = arith.constant 0 : i32
    %c0_i32_1 = arith.constant 0 : i32
    return %c0_i32, %c0_i32_0 : i32, i32
  }
  func.func @transform_5(%arg0: i32) -> (i32, i32) {
    %c0_i32 = arith.constant 0 : i32
    %c0_i32_0 = arith.constant 0 : i32
    return %arg0, %c0_i32 : i32, i32
  }
}

module attributes {stable_mosaic.version = 11 : i64} {
  func.func @_mlp_kernel(%arg0: i32, %arg1: memref<8x128xf32, #tpu.memory_space<vmem>>, %arg2: memref<128x128xf32, #tpu.memory_space<vmem>>, %arg3: memref<1x128xf32, #tpu.memory_space<vmem>>, %arg4: memref<128x128xf32, #tpu.memory_space<vmem>>, %arg5: memref<1x128xf32, #tpu.memory_space<vmem>>, %arg6: memref<8x128xf32, #tpu.memory_space<vmem>>) attributes {dimension_semantics = [#tpu.dimension_semantics<parallel>], iteration_bounds = array<i64: 2>, scalar_prefetch = 0 : i64, scratch_operands = 0 : i64, tpu.core_type = #tpu.core_type<tc>, window_params = [{transform_indices = @transform_0, window_bounds = array<i64: 8, 128>}, {pipeline_mode = #tpu.pipeline_mode<synchronous>, transform_indices = @transform_1, window_bounds = array<i64: 128, 128>}, {pipeline_mode = #tpu.pipeline_mode<synchronous>, transform_indices = @transform_2, window_bounds = array<i64: 1, 128>}, {pipeline_mode = #tpu.pipeline_mode<synchronous>, transform_indices = @transform_3, window_bounds = array<i64: 128, 128>}, {pipeline_mode = #tpu.pipeline_mode<synchronous>, transform_indices = @transform_4, window_bounds = array<i64: 1, 128>}, {transform_indices = @transform_5, window_bounds = array<i64: 8, 128>}]} {
    %c0 = arith.constant 0 : index
    %c0_0 = arith.constant 0 : index
    %0 = vector.load %arg1[%c0, %c0_0] : memref<8x128xf32, #tpu.memory_space<vmem>>, vector<8x128xf32>
    %c0_1 = arith.constant 0 : index
    %c0_2 = arith.constant 0 : index
    %1 = vector.load %arg2[%c0_1, %c0_2] : memref<128x128xf32, #tpu.memory_space<vmem>>, vector<128x128xf32>
    %cst = arith.constant dense<0.000000e+00> : vector<8x128xf32>
    %2 = tpu.matmul %0, %1, %cst {dimension_numbers = #tpu.dot_dimension_numbers<[1], [0], [0], [1], [0, 0, 1, 1], [], []>} : vector<8x128xf32>, vector<128x128xf32>, vector<8x128xf32> -> vector<8x128xf32>
    %c0_3 = arith.constant 0 : index
    %c0_4 = arith.constant 0 : index
    %3 = vector.load %arg3[%c0_3, %c0_4] : memref<1x128xf32, #tpu.memory_space<vmem>>, vector<1x128xf32>
    %4 = vector.broadcast %3 : vector<1x128xf32> to vector<8x128xf32>
    %5 = arith.addf %2, %4 : vector<8x128xf32>
    %cst_5 = arith.constant 2.000000e+01 : f32
    %6 = vector.broadcast %cst_5 : f32 to vector<8x128xf32>
    %7 = arith.minimumf %5, %6 : vector<8x128xf32>
    %8 = math.exp %7 : vector<8x128xf32>
    %9 = arith.mulf %8, %8 : vector<8x128xf32>
    %cst_6 = arith.constant 2.000000e+00 : f32
    %10 = vector.broadcast %cst_6 : f32 to vector<8x128xf32>
    %11 = arith.mulf %10, %8 : vector<8x128xf32>
    %12 = arith.addf %9, %11 : vector<8x128xf32>
    %cst_7 = arith.constant 2.000000e+00 : f32
    %13 = vector.broadcast %cst_7 : f32 to vector<8x128xf32>
    %14 = arith.addf %12, %13 : vector<8x128xf32>
    %15 = tpu.reciprocal %14 {approx = true} : vector<8x128xf32> -> vector<8x128xf32>
    %16 = arith.mulf %12, %15 : vector<8x128xf32>
    %cst_8 = arith.constant 2.000000e+01 : f32
    %17 = vector.broadcast %cst_8 : f32 to vector<8x128xf32>
    %18 = arith.cmpf ogt, %5, %17 : vector<8x128xf32>
    %cst_9 = arith.constant 1.000000e+00 : f32
    %19 = vector.broadcast %cst_9 : f32 to vector<8x128xf32>
    %20 = arith.select %18, %19, %16 : vector<8x128xi1>, vector<8x128xf32>
    %21 = arith.mulf %5, %20 : vector<8x128xf32>
    %c0_10 = arith.constant 0 : index
    %c0_11 = arith.constant 0 : index
    %22 = vector.load %arg4[%c0_10, %c0_11] : memref<128x128xf32, #tpu.memory_space<vmem>>, vector<128x128xf32>
    %cst_12 = arith.constant dense<0.000000e+00> : vector<8x128xf32>
    %23 = tpu.matmul %21, %22, %cst_12 {dimension_numbers = #tpu.dot_dimension_numbers<[1], [0], [0], [1], [0, 0, 1, 1], [], []>} : vector<8x128xf32>, vector<128x128xf32>, vector<8x128xf32> -> vector<8x128xf32>
    %c0_13 = arith.constant 0 : index
    %c0_14 = arith.constant 0 : index
    %24 = vector.load %arg5[%c0_13, %c0_14] : memref<1x128xf32, #tpu.memory_space<vmem>>, vector<1x128xf32>
    %25 = vector.broadcast %24 : vector<1x128xf32> to vector<8x128xf32>
    %26 = arith.addf %23, %25 : vector<8x128xf32>
    %c0_15 = arith.constant 0 : index
    %c0_16 = arith.constant 0 : index
    %27 = vector.load %arg6[%c0_15, %c0_16] : memref<8x128xf32, #tpu.memory_space<vmem>>, vector<8x128xf32>
    tpu.vector_store %arg6[%c0_15, %c0_16], %26 {strides = array<i32>} : memref<8x128xf32, #tpu.memory_space<vmem>>, vector<8x128xf32>,
    return
  }
  func.func @transform_0(%arg0: i32) -> (i32, i32) {
    %c0_i32 = arith.constant 0 : i32
    %c0_i32_0 = arith.constant 0 : i32
    return %arg0, %c0_i32 : i32, i32
  }
  func.func @transform_1(%arg0: i32) -> (i32, i32) {
    %c0_i32 = arith.constant 0 : i32
    %c0_i32_0 = arith.constant 0 : i32
    %c0_i32_1 = arith.constant 0 : i32
    return %c0_i32, %c0_i32_0 : i32, i32
  }
  func.func @transform_2(%arg0: i32) -> (i32, i32) {
    %c0_i32 = arith.constant 0 : i32
    %c0_i32_0 = arith.constant 0 : i32
    %c0_i32_1 = arith.constant 0 : i32
    return %c0_i32, %c0_i32_0 : i32, i32
  }
  func.func @transform_3(%arg0: i32) -> (i32, i32) {
    %c0_i32 = arith.constant 0 : i32
    %c0_i32_0 = arith.constant 0 : i32
    %c0_i32_1 = arith.constant 0 : i32
    return %c0_i32, %c0_i32_0 : i32, i32
  }
  func.func @transform_4(%arg0: i32) -> (i32, i32) {
    %c0_i32 = arith.constant 0 : i32
    %c0_i32_0 = arith.constant 0 : i32
    %c0_i32_1 = arith.constant 0 : i32
    return %c0_i32, %c0_i32_0 : i32, i32
  }
  func.func @transform_5(%arg0: i32) -> (i32, i32) {
    %c0_i32 = arith.constant 0 : i32
    %c0_i32_0 = arith.constant 0 : i32
    return %arg0, %c0_i32 : i32, i32
  }
}

</mosaic_0001>

<bundles_post_ra>
// kernel: tpu_custom_call.1
= control target key start
LH: loop header
LB: loop body
LE: loop exit
PB: predicated region body
PF: predicated region fallthrough
CT: control target
= control target key end

     0   :  { %10 = vsyncpa [#allocation3], 0  ;;  %s1273_s0 = inlined_call_operand.hbm [shape: f32[16,128], index: 0, kind: input, shape index: {}]   ;;  %s1274_s1 = inlined_call_operand.hbm [shape: f32[128,128], index: 1, kind: input, shape index: {}]   ;;  %s1275_s2 = inlined_call_operand.vmem [shape: f32[1,128], index: 2, kind: input, shape index: {}]   ;;  %s1276_s3 = inlined_call_operand.hbm [shape: f32[128,128], index: 3, kind: input, shape index: {}]   ;;  %s1277_s4 = inlined_call_operand.vmem [shape: f32[1,128], index: 4, kind: input, shape index: {}]   ;;  %s1278_s5 = inlined_call_operand.hbm [shape: f32[16,128], index: 5, kind: output, shape index: {}]  }
   0x1   :  { %12 = vsyncpa [#allocation3 + $0x1], 0 }
   0x2   :  { %13 = vsyncpa [#allocation6], 0 }
   0x3   :  { %14 = vsyncpa [#allocation4], 0 }
   0x4   :  { %16 = vsyncpa [#allocation4 + $0x1], 0  ;;  %s1015_s18 = smov 0   ;;  %s1017_s19 = smov 0  }
   0x5   :  { %s1019_s20 = smov 0   ;;  %s1021_s21 = smov 0  }
   0x6 LB: > { %s1036_s22 = sadd.s32 4294967295, %s974_s21   ;;  %s572_s23 = sadd.s32 4294967294, %s974_s21   ;;  %s974_s21 = sphi %s1021_s21, %s1298_s21   ;;  %s970_s20 = sphi %s1019_s20, %s1297_s20   ;;  %s966_s19 = sphi %s1017_s19, %s1296_s19   ;;  %s962_s18 = sphi %s1015_s18, %s1295_s18  }
   0x7   : > { %p42_p0 = scmp.ne.s32.totalorder %s966_s19, %s962_s18  ;;  %p1279_p1 = scmp.eq.s32.totalorder %s1036_s22, 0 }
   0x8   : > { %p156_p3 = scmp.eq.s32.totalorder %s572_s23, 1  ;;  %p573_p5 = scmp.ge.s32.totalorder %s974_s21, 1 }
   0x9   : > { %p1045_p4 = por %p1279_p1, %p42_p0  ;;  %p163_p7 = scmp.lt.s32.totalorder %s974_s21, 3 }
   0xa   : > { %p1050_p6 = por %p156_p3, %p42_p0  ;;  %s976_s27 = smov [#allocation5]  }
   0xb   : > { %s1282_s24 = scalar_select %p1045_p4, 1, 0 }
   0xc   : > { %s1283_s25 = scalar_select %p1050_p6, 1, 0 }
   0xd   : > { %p1055_p8 = pnand %p573_p5, %p163_p7  ;;  %s175_s28 = sshll.u32 %s976_s27, 4  ;;  %s1059_s28 = int_to_ptr.vmem [resolvable:$true] %s175_s28 }
   0xe   : > { %s977_s30 = smov [#allocation7]   ;;  %s818_s9 = scalar_lea.hbm %s1274_s1, 2048 }
   0xf   : > { %p754_p9 = pneg %p1055_p8  ;;  %s191_s6 = sshll.u32 %s977_s30, 4  ;;  %s1070_s6 = int_to_ptr.vmem [resolvable:$true] %s191_s6 }
  0x10   : > { %p819_p12 = scmp.ne.s32.totalorder %s1274_s1, %s818_s9  ;;  %p825_p5 = scmp.lt.u32.totalorder %s818_s9, %s1274_s1 }
  0x11   : > { %p1066_p11 = pnand %p754_p9, %p1279_p1 }
  0x13   : > { %p820_p13 = pneg %p1066_p11 }
  0x15   : > { %p821_p0 = pnand %p820_p13, %p819_p12 }
  0x17   : > { %p822_p3 = pneg %p821_p0 }
  0x19   : > { %p827_p7 = pnand %p825_p5, %p822_p3 }
  0x1b   : > { %830 = shalt.err (!%p827_p7)
}
  0x1c   : > { %s831_s14 = scalar_lea.vmem %s1059_s28, 2048  ;;  %p839_p2 = scmp.lt.s32.totalorder %s1059_s28, %s1059_s28 }
  0x1d   : > { %p832_p9 = scmp.ne.s32.totalorder %s1059_s28, %s831_s14  ;;  %p840_p12 = scmp.lt.s32.totalorder %s831_s14, %s831_s14 }
  0x1f   : > { %p834_p10 = pnand %p832_p9, %p820_p13  ;;  %p841_p0 = por %p840_p12, %p839_p2 }
  0x21   : > { %p835_p1 = pneg %p834_p10 }
  0x23   : > { %p842_p6 = pnand %p841_p0, %p835_p1 }
  0x25   : > { %845 = shalt.err (!%p842_p6)
}
  0x26   : > { %s978_s15 = smov 128   ;;  %s979_s16 = smov 8  }
  0x27   : > { %757 = dma.hbm_to_vmem [thread:$0]  (!%p1066_p11), %s1274_s1, 2048, %s1059_s28, [#allocation6], %s978_s15, %s978_s15, %s979_s16  }
  0x28   : > { %s846_s7 = scalar_lea.hbm %s1276_s3, 2048 }
  0x29   : > { %p847_p2 = scmp.ne.s32.totalorder %s1276_s3, %s846_s7  ;;  %p853_p10 = scmp.lt.u32.totalorder %s846_s7, %s1276_s3 }
  0x2b   : > { %p849_p1 = pnand %p847_p2, %p820_p13 }
  0x2d   : > { %p850_p6 = pneg %p849_p1 }
  0x2f   : > { %p855_p3 = pnand %p853_p10, %p850_p6 }
  0x31   : > { %858 = shalt.err (!%p855_p3)
}
  0x32   : > { %s859_s28 = scalar_lea.vmem %s1070_s6, 2048  ;;  %p867_p12 = scmp.lt.s32.totalorder %s1070_s6, %s1070_s6 }
  0x33   : > { %p860_p5 = scmp.ne.s32.totalorder %s1070_s6, %s859_s28  ;;  %p868_p0 = scmp.lt.s32.totalorder %s859_s28, %s859_s28 }
  0x35   : > { %p862_p7 = pnand %p860_p5, %p820_p13  ;;  %p869_p2 = por %p868_p0, %p867_p12 }
  0x37   : > { %p863_p9 = pneg %p862_p7 }
  0x39   : > { %p870_p1 = pnand %p869_p2, %p863_p9 }
  0x3b   : > { %873 = shalt.err (!%p870_p1)
}
  0x3c   : > { %760 = dma.hbm_to_vmem [thread:$0]  (!%p1066_p11), %s1276_s3, 2048, %s1070_s6, [#allocation6], %s978_s15, %s978_s15, %s979_s16  }
  0x3d   : > { %s1125_s14 = sadd.s32 1, %s974_s21   ;;  %s29_s29 = sadd.s32 1, %s970_s20 }
  0x3e   : > { %s26_s17 = ssub.s32 %s974_s21, %s1125_s14  ;;  %p36_p13 = scmp.ne.s32.totalorder %s970_s20, %s966_s19 }
  0x3f   : > { %p27_p6 = scmp.eq.s32.totalorder %s26_s17, 0  ;;  %p37_p10 = scmp.eq.s32.totalorder %s974_s21, 0 }
  0x40   : > { %p1286_p3 = scmp.eq.s32.totalorder %s1036_s22, 1  ;;  %p771_p7 = scmp.lt.s32.totalorder %s974_s21, 2 }
  0x41   : > { %s1141_s27 = scalar_select %p27_p6, %s970_s20, %s29_s29  }
  0x42   : > { %p1135_p5 = por %p1286_p3, %p36_p13  ;;  %p38_p9 = por %p37_p10, %p36_p13 }
  0x43   : > { %s208_s30 = sand.u32 1, %s970_s20   ;;  %s578_s6 = sshll.u32 %s974_s21, 7 }
  0x44   : > { %s1287_s23 = scalar_select %p1135_p5, 1, 0 }
  0x45   : > { %s577_s7 = sshll.u32 %s208_s30, 3  ;;  %s1148_s8 = scalar_lea.hbm %s1273_s0, %s578_s6 }
  0x46   : > { %s212_s9 = scalar_lea.vmem [#allocation2], %s577_s7  ;;  %p1152_p11 = pnand %p771_p7, %p38_p9 }
  0x47   : > { %s219_s10 = sshll.u32 %s212_s9, 4  ;;  %s209_s28 = scalar_lea.sflag [#allocation3], %s208_s30  ;;  %s1150_s10 = int_to_ptr.vmem [resolvable:$true] %s219_s10 }
  0x48   : > { %s874_s12 = scalar_lea.hbm %s1148_s8, 128  ;;  %p876_p0 = pneg %p1152_p11 }
  0x49   : > { %p875_p12 = scmp.ne.s32.totalorder %s1148_s8, %s874_s12  ;;  %s879_s17 = scalar_lea.hbm %s1273_s0, 256 }
  0x4a   : > { %p880_p13 = scmp.lt.u32.totalorder %s1148_s8, %s1273_s0  ;;  %p881_p6 = scmp.lt.u32.totalorder %s879_s17, %s874_s12 }
  0x4b   : > { %p877_p2 = pnand %p876_p0, %p875_p12  ;;  %p883_p3 = scmp.lt.u32.totalorder %s874_s12, %s1148_s8 }
  0x4c   : > { %p882_p10 = por %p881_p6, %p880_p13 }
  0x4d   : > { %p878_p1 = pneg %p877_p2 }
  0x4e   : > { %p884_p7 = por %p883_p3, %p882_p10 }
  0x50   : > { %p885_p9 = pnand %p884_p7, %p878_p1 }
  0x52   : > { %888 = shalt.err (!%p885_p9)
}
  0x53   : > { %s889_s30 = scalar_lea.vmem %s1150_s10, 128  ;;  %s980_s15 = smov [#allocation2]  }
  0x54   : > { %p890_p12 = scmp.ne.s32.totalorder %s1150_s10, %s889_s30  ;;  %s894_s16 = sshll.u32 %s980_s15, 4  ;;  %s895_s16 = int_to_ptr.vmem [resolvable:$false] %s894_s16 }
  0x55   : > { %s896_s9 = scalar_lea.vmem %s895_s16, 256  ;;  %p897_p4 = scmp.lt.s32.totalorder %s1150_s10, %s895_s16 }
  0x56   : > { %p892_p2 = pnand %p890_p12, %p876_p0  ;;  %p898_p13 = scmp.lt.s32.totalorder %s896_s9, %s889_s30 }
  0x58   : > { %p893_p5 = pneg %p892_p2  ;;  %p899_p6 = por %p898_p13, %p897_p4 }
  0x5a   : > { %p900_p10 = pnand %p899_p6, %p893_p5 }
  0x5c   : > { %903 = shalt.err (!%p900_p10)
}
  0x5d   : > { %764 = dma.hbm_to_vmem [thread:$0]  (!%p1152_p11), %s1148_s8, 128, %s1150_s10, %s209_s28  }
  0x5e   : > { %228 = sbr.rel (%p1055_p8) target bundleno = 618 (0x26a), region = 40  ;;  %s1184_s12 = sand.u32 (!%p1055_p8), 1, %s966_s19  }
  0x5f   : > { %s580_s13 = sshll.u32 (!%p1055_p8), %s1184_s12, 3  ;;  %s231_s29 = scalar_lea.sflag (!%p1055_p8), [#allocation3], %s1184_s12 }
  0x60   : > { %s1190_s17 = scalar_lea.vmem (!%p1055_p8), [#allocation2], %s580_s13  ;;  %p1289_p4 = scmp.ne.s32.totalorder (!%p1055_p8), %s1282_s24, 0 }
  0x65   : > { %949 = dma.done.wait (%p1289_p4), %s231_s29, 128  }
  0x66   : > { %951 = vsyncadd (%p1289_p4), %s231_s29, 4294967168  ;;  %p1290_p5 = scmp.eq.s32.totalorder %s1036_s22, 0 }
  0x68   : > { %953 = dma.done.wait (%p1290_p5), [#allocation6], 4096   ;;  %p1291_p8 = pmov %p1290_p5 }
  0x69   : > { %v981_v0 = vmov 0.0|0.0   ;;  %vm982_vm0 = vmmov 0   ;;  %v983_v1 = vmov 0.0   ;;  %v270_v2 = vld [vmem:[#allocation5] sm:$0xff]  ;;  %v271_v3 = vld [vmem:[#allocation5 + $0x8] sm:$0xff]  ;;  %v272_v4 = vld [vmem:[#allocation5 + $0x10] sm:$0xff] }
  0x6a   : > { %955 = vsyncadd (%p1291_p8), [#allocation6], 4294963200  ;;  %694 = vmatprep.subr.bf16.mxu0 %v981_v0  ;;  %656 = vmatprep.mubr.msk.f32.mxu0 %vm982_vm0, %v983_v1  ;;  %v695_v5 = vpack.c.bf16 %v271_v3, %v270_v2  ;;  %v273_v6 = vld [vmem:[#allocation5 + $0x18] sm:$0xff]  ;;  %v274_v8 = vld [vmem:[#allocation5 + $0x20] sm:$0xff]  ;;  %s587_s11 = sshll.u32 %s1036_s22, 7  ;;  %s268_s28 = scalar_lea.vmem [#allocation8], %s580_s13 }
  0x6b   : > { %718 = vmatprep.subr.bf16.mxu1 %v981_v0  ;;  %691 = vmatprep.mubr.msk.f32.mxu1 %vm982_vm0, %v983_v1  ;;  %v698_v7 = vpack.c.bf16 %v273_v6, %v272_v4  ;;  %v275_v9 = vld [vmem:[#allocation5 + $0x28] sm:$0xff]  ;;  %v276_v11 = vld [vmem:[#allocation5 + $0x30] sm:$0xff]  ;;  %v277_v12 = vld [vmem:[#allocation5 + $0x38] sm:$0xff]  ;;  %s483_s7 = sshll.u32 %s268_s28, 4  ;;  %s1229_s15 = scalar_lea.hbm %s1278_s5, %s587_s11  ;;  %s1231_s7 = int_to_ptr.vmem [resolvable:$true] %s483_s7 }
  0x6c   : > { %696 = vmatpush3.bf16.msra.mxu0 %v695_v5  ;;  %v701_v10 = vpack.c.bf16 %v275_v9, %v274_v8  ;;  %v704_v13 = vpack.c.bf16 %v277_v12, %v276_v11  ;;  %v278_v14 = vld [vmem:[#allocation5 + $0x40] sm:$0xff]  ;;  %v279_v15 = vld [vmem:[#allocation5 + $0x48] sm:$0xff]  ;;  %v280_v17 = vld [vmem:[#allocation5 + $0x50] sm:$0xff]  ;;  %s470_s16 = scalar_lea.sflag [#allocation4], %s1184_s12  ;;  %s904_s9 = scalar_lea.vmem %s1231_s7, 128 }
  0x6d   : > { %697 = vmatprep.subr.bf16.mxu0 %v981_v0  ;;  %v707_v16 = vpack.c.bf16 %v279_v15, %v278_v14  ;;  %v281_v18 = vld [vmem:[#allocation5 + $0x58] sm:$0xff]  ;;  %v282_v20 = vld [vmem:[#allocation5 + $0x60] sm:$0xff]  ;;  %v283_v21 = vld [vmem:[#allocation5 + $0x68] sm:$0xff]  ;;  %p905_p11 = scmp.ne.s32.totalorder %s1231_s7, %s904_s9  ;;  %p1292_p0 = scmp.ne.s32.totalorder %s1287_s23, 0 }
  0x6e   : > { %v710_v19 = vpack.c.bf16 %v281_v18, %v280_v17  ;;  %v713_v22 = vpack.c.bf16 %v283_v21, %v282_v20  ;;  %v284_v23 = vld [vmem:[#allocation5 + $0x70] sm:$0xff]  ;;  %v285_v24 = vld [vmem:[#allocation5 + $0x78] sm:$0xff]  ;;  %v375_v27 = vld [vmem:[#allocation7] sm:$0xff]  ;;  %s984_s22 = smov [#allocation8]  }
  0x6f   : > { %v716_v25 = vpack.c.bf16 %v285_v24, %v284_v23  ;;  %v269_v26 = vld [vmem:[%s1190_s17] sm:$0xff]  ;;  %v376_v28 = vld [vmem:[#allocation7 + $0x8] sm:$0xff]  ;;  %v379_v33 = vld [vmem:[#allocation7 + $0x20] sm:$0xff]  ;;  %p906_p1 = pnand %p905_p11, %p1292_p0  ;;  %s908_s13 = sshll.u32 %s984_s22, 4  ;;  %s909_s13 = int_to_ptr.vmem [resolvable:$false] %s908_s13 }
  0x70   : > { %699 = vmatpush3.bf16.msra.mxu0 %v698_v7  ;;  %v719_v29 = vpack.c.bf16 %v376_v28, %v375_v27  ;;  %v377_v30 = vld [vmem:[#allocation7 + $0x10] sm:$0xff]  ;;  %v378_v31 = vld [vmem:[#allocation7 + $0x18] sm:$0xff]  ;;  %v380_v34 = vld [vmem:[#allocation7 + $0x28] sm:$0xff]  ;;  %s910_s29 = scalar_lea.vmem %s909_s13, 256  ;;  %p911_p7 = scmp.lt.s32.totalorder %s1231_s7, %s909_s13 }
  0x71   : > { %700 = vmatprep.subr.bf16.mxu0 %v981_v0  ;;  %v722_v32 = vpack.c.bf16 %v378_v31, %v377_v30  ;;  %v725_v35 = vpack.c.bf16 %v380_v34, %v379_v33  ;;  %v381_v36 = vld [vmem:[#allocation7 + $0x30] sm:$0xff]  ;;  %v382_v37 = vld [vmem:[#allocation7 + $0x38] sm:$0xff]  ;;  %v383_v39 = vld [vmem:[#allocation7 + $0x40] sm:$0xff]  ;;  %p907_p3 = pneg %p906_p1  ;;  %p912_p9 = scmp.lt.s32.totalorder %s910_s29, %s904_s9 }
  0x72   : > { %720 = vmatpush3.bf16.msra.mxu1 %v719_v29  ;;  %v728_v38 = vpack.c.bf16 %v382_v37, %v381_v36  ;;  %v384_v40 = vld [vmem:[#allocation7 + $0x48] sm:$0xff]  ;;  %v385_v42 = vld [vmem:[#allocation7 + $0x50] sm:$0xff]  ;;  %v386_v43 = vld [vmem:[#allocation7 + $0x58] sm:$0xff] }
  0x73   : > { %721 = vmatprep.subr.bf16.mxu1 %v981_v0  ;;  %v731_v41 = vpack.c.bf16 %v384_v40, %v383_v39  ;;  %v734_v44 = vpack.c.bf16 %v386_v43, %v385_v42  ;;  %v387_v45 = vld [vmem:[#allocation7 + $0x60] sm:$0xff]  ;;  %v388_v46 = vld [vmem:[#allocation7 + $0x68] sm:$0xff]  ;;  %v389_v48 = vld [vmem:[#allocation7 + $0x70] sm:$0xff]  ;;  %p913_p12 = por %p912_p9, %p911_p7 }
  0x74   : > { %702 = vmatpush3.bf16.msra.mxu0 %v701_v10  ;;  %v737_v47 = vpack.c.bf16 %v388_v46, %v387_v45  ;;  %v390_v49 = vld [vmem:[#allocation7 + $0x78] sm:$0xff]  ;;  %v584_v51 = vld [vmem:[%s1275_s2] ss:$0 sm:$0xff] }
  0x75   : > { %703 = vmatprep.subr.bf16.mxu0 %v981_v0  ;;  %v740_v50 = vpack.c.bf16 %v390_v49, %v389_v48  ;;  %v585_v2 = vld [vmem:[%s1277_s4] ss:$0 sm:$0xff]  ;;  %p914_p2 = pnand %p913_p12, %p907_p3 }
  0x76   : > { %723 = vmatpush3.bf16.msra.mxu1 %v722_v32 }
  0x77   : > { %724 = vmatprep.subr.bf16.mxu1 %v981_v0 }
  0x78   : > { %705 = vmatpush3.bf16.msra.mxu0 %v704_v13 }
  0x79   : > { %706 = vmatprep.subr.bf16.mxu0 %v981_v0 }
  0x7a   : > { %726 = vmatpush3.bf16.msra.mxu1 %v725_v35 }
  0x7b   : > { %727 = vmatprep.subr.bf16.mxu1 %v981_v0 }
  0x7c   : > { %708 = vmatpush3.bf16.msra.mxu0 %v707_v16 }
  0x7d   : > { %709 = vmatprep.subr.bf16.mxu0 %v981_v0 }
  0x7e   : > { %729 = vmatpush3.bf16.msra.mxu1 %v728_v38 }
  0x7f   : > { %730 = vmatprep.subr.bf16.mxu1 %v981_v0 }
  0x80   : > { %711 = vmatpush3.bf16.msra.mxu0 %v710_v19 }
  0x81   : > { %712 = vmatprep.subr.bf16.mxu0 %v981_v0 }
  0x82   : > { %732 = vmatpush3.bf16.msra.mxu1 %v731_v41 }
  0x83   : > { %733 = vmatprep.subr.bf16.mxu1 %v981_v0 }
  0x84   : > { %714 = vmatpush3.bf16.msra.mxu0 %v713_v22 }
  0x85   : > { %715 = vmatprep.subr.bf16.mxu0 %v981_v0 }
  0x86   : > { %735 = vmatpush3.bf16.msra.mxu1 %v734_v44 }
  0x87   : > { %736 = vmatprep.subr.bf16.mxu1 %v981_v0 }
  0x88   : > { %717 = vmatpush3.bf16.msra.mxu0 %v716_v25 }
  0x8a   : > { %738 = vmatpush3.bf16.msra.mxu1 %v737_v47 }
  0x8b   : > { %657 = vmatmul.mubr.f32.vlgmr.msra.gmra.mrb[0].mxu0 %v269_v26  ;;  %739 = vmatprep.subr.bf16.mxu1 %v981_v0 }
  0x8e   : > { %741 = vmatpush3.bf16.msra.mxu1 %v740_v50 }
 0x15e   : > { %v359_v52 = vpop.f32.mrb[0].mxu0 }
 0x15f   : > { %v360_v53 = vadd.f32 %v584_v51, %v359_v52  ;;  %v658_v54 = vpop.f32.mrb[1].mxu0 }
 0x161   : > { %v363_v55 = vmin.f32 %v360_v53, 20.0  ;;  %vm372_vm1 = vcmp.gt.f32.partialorder %v360_v53, 20.0 }
 0x163   : > { %v364_v56 = vmul.f32 1.442695, %v363_v55 }
 0x165   : > { %814 = vpow2.f32 %v364_v56 }
 0x16f   : > { %v815_v57 = vpop.eup %814 }
 0x170   : > { %v366_v58 = vmul.f32 %v815_v57, %v815_v57  ;;  %v367_v59 = vmul.f32 2.0, %v815_v57 }
 0x172   : > { %v368_v60 = vadd.f32 %v367_v59, %v366_v58 }
 0x174   : > { %v369_v61 = vadd.f32 2.0, %v368_v60 }
 0x176   : > { %816 = vrcp.f32 %v369_v61 }
 0x180   : > { %v817_v62 = vpop.eup %816 }
 0x181   : > { %v371_v63 = vmul.f32 %v817_v62, %v368_v60 }
 0x183   : > { %v373_v0 = vsel %vm372_vm1, 1.0, %v371_v63 }
 0x184   : > { %v374_v1 = vmul.f32 %v373_v0, %v360_v53 }
 0x186   : > { %692 = vmatmul.mubr.f32.vlgmr.msra.gmra.mrb[0].mxu1 %v374_v1 }
 0x259   : > { %v464_v3 = vpop.f32.mrb[0].mxu1 }
 0x25a   : > { %v465_v4 = vadd.f32 %v585_v2, %v464_v3  ;;  %v693_v5 = vpop.f32.mrb[1].mxu1 }
 0x25c   : > { %468 = vst [vmem:[%s268_s28] sm:$0xff] %v465_v4 }
 0x25d   : > { %917 = shalt.err (!%p914_p2)
}
 0x25e   : > { %s918_s12 = scalar_lea.hbm %s1229_s15, 128  ;;  %s922_s26 = scalar_lea.hbm %s1278_s5, 256 }
 0x25f   : > { %p919_p13 = scmp.ne.s32.totalorder %s1229_s15, %s918_s12  ;;  %p923_p4 = scmp.lt.u32.totalorder %s1229_s15, %s1278_s5 }
 0x260   : > { %p924_p5 = scmp.lt.u32.totalorder %s922_s26, %s918_s12  ;;  %p926_p11 = scmp.lt.u32.totalorder %s918_s12, %s1229_s15 }
 0x261   : > { %p920_p6 = pnand %p919_p13, %p1292_p0 }
 0x262   : > { %p925_p8 = por %p924_p5, %p923_p4 }
 0x263   : > { %p921_p10 = pneg %p920_p6 }
 0x264   : > { %p927_p1 = por %p926_p11, %p925_p8 }
 0x266   : > { %p928_p3 = pnand %p927_p1, %p921_p10 }
 0x268   : > { %931 = shalt.err (!%p928_p3)
}
 0x269   : > { %752 = dma.vmem_to_hbm [thread:$0]  (%p1292_p0), %s1231_s7, 128, %s1229_s15, %s470_s16  }
 0x26a PF: > { %s495_s11 = sand.u32 1, %s962_s18   ;;  %p1293_p7 = scmp.ne.s32.totalorder %s1283_s25, 0 }
 0x26b   : > { %p1294_p9 = scmp.ge.s32.totalorder %s974_s21, 2  ;;  %s496_s28 = scalar_lea.sflag [#allocation4], %s495_s11 }
 0x26d   : > { %p766_p12 = pnand %p1294_p9, %p1293_p7 }
 0x26f   : > { %957 = dma.done.wait (!%p766_p12), %s496_s28, 128  }
 0x270   : > { %959 = vsyncadd (!%p766_p12), %s496_s28, 4294967168  ;;  %p19_p2 = scmp.ge.s32.totalorder %s1125_s14, 4   ;;  %s1295_s18 = smov %s966_s19 }
 0x271   : > { %s1296_s19 = smov %s970_s20  ;;  %s1297_s20 = smov %s1141_s27 }
 0x272   : > { %s1298_s21 = smov %s1125_s14  ;;  %21 = sbr.rel (!%p19_p2) target bundleno = 6 (0x6), region = 93 }
 0x279   :  { %501 = vsyncpa [#allocation3], 1 }
 0x27a   :  { %503 = vsyncpa [#allocation3 + $0x1], 1 }
 0x27b   :  { %504 = vsyncpa [#allocation6], 1 }
 0x27c   :  { %505 = vsyncpa [#allocation4], 1 }
 0x27d   :  { %507 = vsyncpa [#allocation4 + $0x1], 1 }

// kernel: tpu_custom_call.1
= control target key start
LH: loop header
LB: loop body
LE: loop exit
PB: predicated region body
PF: predicated region fallthrough
CT: control target
= control target key end

     0   :  { %10 = vsyncpa [#allocation3], 0  ;;  %s1273_s0 = inlined_call_operand.hbm [shape: f32[16,128], index: 0, kind: input, shape index: {}]   ;;  %s1274_s1 = inlined_call_operand.hbm [shape: f32[128,128], index: 1, kind: input, shape index: {}]   ;;  %s1275_s2 = inlined_call_operand.vmem [shape: f32[1,128], index: 2, kind: input, shape index: {}]   ;;  %s1276_s3 = inlined_call_operand.hbm [shape: f32[128,128], index: 3, kind: input, shape index: {}]   ;;  %s1277_s4 = inlined_call_operand.vmem [shape: f32[1,128], index: 4, kind: input, shape index: {}]   ;;  %s1278_s5 = inlined_call_operand.hbm [shape: f32[16,128], index: 5, kind: output, shape index: {}]  }
   0x1   :  { %12 = vsyncpa [#allocation3 + $0x1], 0 }
   0x2   :  { %13 = vsyncpa [#allocation6], 0 }
   0x3   :  { %14 = vsyncpa [#allocation4], 0 }
   0x4   :  { %16 = vsyncpa [#allocation4 + $0x1], 0  ;;  %s1015_s18 = smov 0   ;;  %s1017_s19 = smov 0  }
   0x5   :  { %s1019_s20 = smov 0   ;;  %s1021_s21 = smov 0  }
   0x6 LB: > { %s1036_s22 = sadd.s32 4294967295, %s974_s21   ;;  %s572_s23 = sadd.s32 4294967294, %s974_s21   ;;  %s974_s21 = sphi %s1021_s21, %s1298_s21   ;;  %s970_s20 = sphi %s1019_s20, %s1297_s20   ;;  %s966_s19 = sphi %s1017_s19, %s1296_s19   ;;  %s962_s18 = sphi %s1015_s18, %s1295_s18  }
   0x7   : > { %p42_p0 = scmp.ne.s32.totalorder %s966_s19, %s962_s18  ;;  %p1279_p1 = scmp.eq.s32.totalorder %s1036_s22, 0 }
   0x8   : > { %p156_p3 = scmp.eq.s32.totalorder %s572_s23, 1  ;;  %p573_p5 = scmp.ge.s32.totalorder %s974_s21, 1 }
   0x9   : > { %p1045_p4 = por %p1279_p1, %p42_p0  ;;  %p163_p7 = scmp.lt.s32.totalorder %s974_s21, 3 }
   0xa   : > { %p1050_p6 = por %p156_p3, %p42_p0  ;;  %s976_s27 = smov [#allocation5]  }
   0xb   : > { %s1282_s24 = scalar_select %p1045_p4, 1, 0 }
   0xc   : > { %s1283_s25 = scalar_select %p1050_p6, 1, 0 }
   0xd   : > { %p1055_p8 = pnand %p573_p5, %p163_p7  ;;  %s175_s28 = sshll.u32 %s976_s27, 4  ;;  %s1059_s28 = int_to_ptr.vmem [resolvable:$true] %s175_s28 }
   0xe   : > { %s977_s30 = smov [#allocation7]   ;;  %s818_s9 = scalar_lea.hbm %s1274_s1, 2048 }
   0xf   : > { %p754_p9 = pneg %p1055_p8  ;;  %s191_s6 = sshll.u32 %s977_s30, 4  ;;  %s1070_s6 = int_to_ptr.vmem [resolvable:$true] %s191_s6 }
  0x10   : > { %p819_p12 = scmp.ne.s32.totalorder %s1274_s1, %s818_s9  ;;  %p825_p5 = scmp.lt.u32.totalorder %s818_s9, %s1274_s1 }
  0x11   : > { %p1066_p11 = pnand %p754_p9, %p1279_p1 }
  0x13   : > { %p820_p13 = pneg %p1066_p11 }
  0x15   : > { %p821_p0 = pnand %p820_p13, %p819_p12 }
  0x17   : > { %p822_p3 = pneg %p821_p0 }
  0x19   : > { %p827_p7 = pnand %p825_p5, %p822_p3 }
  0x1b   : > { %830 = shalt.err (!%p827_p7)
}
  0x1c   : > { %s831_s14 = scalar_lea.vmem %s1059_s28, 2048  ;;  %p839_p2 = scmp.lt.s32.totalorder %s1059_s28, %s1059_s28 }
  0x1d   : > { %p832_p9 = scmp.ne.s32.totalorder %s1059_s28, %s831_s14  ;;  %p840_p12 = scmp.lt.s32.totalorder %s831_s14, %s831_s14 }
  0x1f   : > { %p834_p10 = pnand %p832_p9, %p820_p13  ;;  %p841_p0 = por %p840_p12, %p839_p2 }
  0x21   : > { %p835_p1 = pneg %p834_p10 }
  0x23   : > { %p842_p6 = pnand %p841_p0, %p835_p1 }
  0x25   : > { %845 = shalt.err (!%p842_p6)
}
  0x26   : > { %s978_s15 = smov 128   ;;  %s979_s16 = smov 8  }
  0x27   : > { %757 = dma.hbm_to_vmem [thread:$0]  (!%p1066_p11), %s1274_s1, 2048, %s1059_s28, [#allocation6], %s978_s15, %s978_s15, %s979_s16  }
  0x28   : > { %s846_s7 = scalar_lea.hbm %s1276_s3, 2048 }
  0x29   : > { %p847_p2 = scmp.ne.s32.totalorder %s1276_s3, %s846_s7  ;;  %p853_p10 = scmp.lt.u32.totalorder %s846_s7, %s1276_s3 }
  0x2b   : > { %p849_p1 = pnand %p847_p2, %p820_p13 }
  0x2d   : > { %p850_p6 = pneg %p849_p1 }
  0x2f   : > { %p855_p3 = pnand %p853_p10, %p850_p6 }
  0x31   : > { %858 = shalt.err (!%p855_p3)
}
  0x32   : > { %s859_s28 = scalar_lea.vmem %s1070_s6, 2048  ;;  %p867_p12 = scmp.lt.s32.totalorder %s1070_s6, %s1070_s6 }
  0x33   : > { %p860_p5 = scmp.ne.s32.totalorder %s1070_s6, %s859_s28  ;;  %p868_p0 = scmp.lt.s32.totalorder %s859_s28, %s859_s28 }
  0x35   : > { %p862_p7 = pnand %p860_p5, %p820_p13  ;;  %p869_p2 = por %p868_p0, %p867_p12 }
  0x37   : > { %p863_p9 = pneg %p862_p7 }
  0x39   : > { %p870_p1 = pnand %p869_p2, %p863_p9 }
  0x3b   : > { %873 = shalt.err (!%p870_p1)
}
  0x3c   : > { %760 = dma.hbm_to_vmem [thread:$0]  (!%p1066_p11), %s1276_s3, 2048, %s1070_s6, [#allocation6], %s978_s15, %s978_s15, %s979_s16  }
  0x3d   : > { %s1125_s14 = sadd.s32 1, %s974_s21   ;;  %s29_s29 = sadd.s32 1, %s970_s20 }
  0x3e   : > { %s26_s17 = ssub.s32 %s974_s21, %s1125_s14  ;;  %p36_p13 = scmp.ne.s32.totalorder %s970_s20, %s966_s19 }
  0x3f   : > { %p27_p6 = scmp.eq.s32.totalorder %s26_s17, 0  ;;  %p37_p10 = scmp.eq.s32.totalorder %s974_s21, 0 }
  0x40   : > { %p1286_p3 = scmp.eq.s32.totalorder %s1036_s22, 1  ;;  %p771_p7 = scmp.lt.s32.totalorder %s974_s21, 2 }
  0x41   : > { %s1141_s27 = scalar_select %p27_p6, %s970_s20, %s29_s29  }
  0x42   : > { %p1135_p5 = por %p1286_p3, %p36_p13  ;;  %p38_p9 = por %p37_p10, %p36_p13 }
  0x43   : > { %s208_s30 = sand.u32 1, %s970_s20   ;;  %s578_s6 = sshll.u32 %s974_s21, 7 }
  0x44   : > { %s1287_s23 = scalar_select %p1135_p5, 1, 0 }
  0x45   : > { %s577_s7 = sshll.u32 %s208_s30, 3  ;;  %s1148_s8 = scalar_lea.hbm %s1273_s0, %s578_s6 }
  0x46   : > { %s212_s9 = scalar_lea.vmem [#allocation2], %s577_s7  ;;  %p1152_p11 = pnand %p771_p7, %p38_p9 }
  0x47   : > { %s219_s10 = sshll.u32 %s212_s9, 4  ;;  %s209_s28 = scalar_lea.sflag [#allocation3], %s208_s30  ;;  %s1150_s10 = int_to_ptr.vmem [resolvable:$true] %s219_s10 }
  0x48   : > { %s874_s12 = scalar_lea.hbm %s1148_s8, 128  ;;  %p876_p0 = pneg %p1152_p11 }
  0x49   : > { %p875_p12 = scmp.ne.s32.totalorder %s1148_s8, %s874_s12  ;;  %s879_s17 = scalar_lea.hbm %s1273_s0, 256 }
  0x4a   : > { %p880_p13 = scmp.lt.u32.totalorder %s1148_s8, %s1273_s0  ;;  %p881_p6 = scmp.lt.u32.totalorder %s879_s17, %s874_s12 }
  0x4b   : > { %p877_p2 = pnand %p876_p0, %p875_p12  ;;  %p883_p3 = scmp.lt.u32.totalorder %s874_s12, %s1148_s8 }
  0x4c   : > { %p882_p10 = por %p881_p6, %p880_p13 }
  0x4d   : > { %p878_p1 = pneg %p877_p2 }
  0x4e   : > { %p884_p7 = por %p883_p3, %p882_p10 }
  0x50   : > { %p885_p9 = pnand %p884_p7, %p878_p1 }
  0x52   : > { %888 = shalt.err (!%p885_p9)
}
  0x53   : > { %s889_s30 = scalar_lea.vmem %s1150_s10, 128  ;;  %s980_s15 = smov [#allocation2]  }
  0x54   : > { %p890_p12 = scmp.ne.s32.totalorder %s1150_s10, %s889_s30  ;;  %s894_s16 = sshll.u32 %s980_s15, 4  ;;  %s895_s16 = int_to_ptr.vmem [resolvable:$false] %s894_s16 }
  0x55   : > { %s896_s9 = scalar_lea.vmem %s895_s16, 256  ;;  %p897_p4 = scmp.lt.s32.totalorder %s1150_s10, %s895_s16 }
  0x56   : > { %p892_p2 = pnand %p890_p12, %p876_p0  ;;  %p898_p13 = scmp.lt.s32.totalorder %s896_s9, %s889_s30 }
  0x58   : > { %p893_p5 = pneg %p892_p2  ;;  %p899_p6 = por %p898_p13, %p897_p4 }
  0x5a   : > { %p900_p10 = pnand %p899_p6, %p893_p5 }
  0x5c   : > { %903 = shalt.err (!%p900_p10)
}
  0x5d   : > { %764 = dma.hbm_to_vmem [thread:$0]  (!%p1152_p11), %s1148_s8, 128, %s1150_s10, %s209_s28  }
  0x5e   : > { %228 = sbr.rel (%p1055_p8) target bundleno = 618 (0x26a), region = 40  ;;  %s1184_s12 = sand.u32 (!%p1055_p8), 1, %s966_s19  }
  0x5f   : > { %s580_s13 = sshll.u32 (!%p1055_p8), %s1184_s12, 3  ;;  %s231_s29 = scalar_lea.sflag (!%p1055_p8), [#allocation3], %s1184_s12 }
  0x60   : > { %s1190_s17 = scalar_lea.vmem (!%p1055_p8), [#allocation2], %s580_s13  ;;  %p1289_p4 = scmp.ne.s32.totalorder (!%p1055_p8), %s1282_s24, 0 }
  0x65   : > { %949 = dma.done.wait (%p1289_p4), %s231_s29, 128  }
  0x66   : > { %951 = vsyncadd (%p1289_p4), %s231_s29, 4294967168  ;;  %p1290_p5 = scmp.eq.s32.totalorder %s1036_s22, 0 }
  0x68   : > { %953 = dma.done.wait (%p1290_p5), [#allocation6], 4096   ;;  %p1291_p8 = pmov %p1290_p5 }
  0x69   : > { %v981_v0 = vmov 0.0|0.0   ;;  %vm982_vm0 = vmmov 0   ;;  %v983_v1 = vmov 0.0   ;;  %v270_v2 = vld [vmem:[#allocation5] sm:$0xff]  ;;  %v271_v3 = vld [vmem:[#allocation5 + $0x8] sm:$0xff]  ;;  %v272_v4 = vld [vmem:[#allocation5 + $0x10] sm:$0xff] }
  0x6a   : > { %955 = vsyncadd (%p1291_p8), [#allocation6], 4294963200  ;;  %694 = vmatprep.subr.bf16.mxu0 %v981_v0  ;;  %656 = vmatprep.mubr.msk.f32.mxu0 %vm982_vm0, %v983_v1  ;;  %v695_v5 = vpack.c.bf16 %v271_v3, %v270_v2  ;;  %v273_v6 = vld [vmem:[#allocation5 + $0x18] sm:$0xff]  ;;  %v274_v8 = vld [vmem:[#allocation5 + $0x20] sm:$0xff]  ;;  %s587_s11 = sshll.u32 %s1036_s22, 7  ;;  %s268_s28 = scalar_lea.vmem [#allocation8], %s580_s13 }
  0x6b   : > { %718 = vmatprep.subr.bf16.mxu1 %v981_v0  ;;  %691 = vmatprep.mubr.msk.f32.mxu1 %vm982_vm0, %v983_v1  ;;  %v698_v7 = vpack.c.bf16 %v273_v6, %v272_v4  ;;  %v275_v9 = vld [vmem:[#allocation5 + $0x28] sm:$0xff]  ;;  %v276_v11 = vld [vmem:[#allocation5 + $0x30] sm:$0xff]  ;;  %v277_v12 = vld [vmem:[#allocation5 + $0x38] sm:$0xff]  ;;  %s483_s7 = sshll.u32 %s268_s28, 4  ;;  %s1229_s15 = scalar_lea.hbm %s1278_s5, %s587_s11  ;;  %s1231_s7 = int_to_ptr.vmem [resolvable:$true] %s483_s7 }
  0x6c   : > { %696 = vmatpush3.bf16.msra.mxu0 %v695_v5  ;;  %v701_v10 = vpack.c.bf16 %v275_v9, %v274_v8  ;;  %v704_v13 = vpack.c.bf16 %v277_v12, %v276_v11  ;;  %v278_v14 = vld [vmem:[#allocation5 + $0x40] sm:$0xff]  ;;  %v279_v15 = vld [vmem:[#allocation5 + $0x48] sm:$0xff]  ;;  %v280_v17 = vld [vmem:[#allocation5 + $0x50] sm:$0xff]  ;;  %s470_s16 = scalar_lea.sflag [#allocation4], %s1184_s12  ;;  %s904_s9 = scalar_lea.vmem %s1231_s7, 128 }
  0x6d   : > { %697 = vmatprep.subr.bf16.mxu0 %v981_v0  ;;  %v707_v16 = vpack.c.bf16 %v279_v15, %v278_v14  ;;  %v281_v18 = vld [vmem:[#allocation5 + $0x58] sm:$0xff]  ;;  %v282_v20 = vld [vmem:[#allocation5 + $0x60] sm:$0xff]  ;;  %v283_v21 = vld [vmem:[#allocation5 + $0x68] sm:$0xff]  ;;  %p905_p11 = scmp.ne.s32.totalorder %s1231_s7, %s904_s9  ;;  %p1292_p0 = scmp.ne.s32.totalorder %s1287_s23, 0 }
  0x6e   : > { %v710_v19 = vpack.c.bf16 %v281_v18, %v280_v17  ;;  %v713_v22 = vpack.c.bf16 %v283_v21, %v282_v20  ;;  %v284_v23 = vld [vmem:[#allocation5 + $0x70] sm:$0xff]  ;;  %v285_v24 = vld [vmem:[#allocation5 + $0x78] sm:$0xff]  ;;  %v375_v27 = vld [vmem:[#allocation7] sm:$0xff]  ;;  %s984_s22 = smov [#allocation8]  }
  0x6f   : > { %v716_v25 = vpack.c.bf16 %v285_v24, %v284_v23  ;;  %v269_v26 = vld [vmem:[%s1190_s17] sm:$0xff]  ;;  %v376_v28 = vld [vmem:[#allocation7 + $0x8] sm:$0xff]  ;;  %v379_v33 = vld [vmem:[#allocation7 + $0x20] sm:$0xff]  ;;  %p906_p1 = pnand %p905_p11, %p1292_p0  ;;  %s908_s13 = sshll.u32 %s984_s22, 4  ;;  %s909_s13 = int_to_ptr.vmem [resolvable:$false] %s908_s13 }
  0x70   : > { %699 = vmatpush3.bf16.msra.mxu0 %v698_v7  ;;  %v719_v29 = vpack.c.bf16 %v376_v28, %v375_v27  ;;  %v377_v30 = vld [vmem:[#allocation7 + $0x10] sm:$0xff]  ;;  %v378_v31 = vld [vmem:[#allocation7 + $0x18] sm:$0xff]  ;;  %v380_v34 = vld [vmem:[#allocation7 + $0x28] sm:$0xff]  ;;  %s910_s29 = scalar_lea.vmem %s909_s13, 256  ;;  %p911_p7 = scmp.lt.s32.totalorder %s1231_s7, %s909_s13 }
  0x71   : > { %700 = vmatprep.subr.bf16.mxu0 %v981_v0  ;;  %v722_v32 = vpack.c.bf16 %v378_v31, %v377_v30  ;;  %v725_v35 = vpack.c.bf16 %v380_v34, %v379_v33  ;;  %v381_v36 = vld [vmem:[#allocation7 + $0x30] sm:$0xff]  ;;  %v382_v37 = vld [vmem:[#allocation7 + $0x38] sm:$0xff]  ;;  %v383_v39 = vld [vmem:[#allocation7 + $0x40] sm:$0xff]  ;;  %p907_p3 = pneg %p906_p1  ;;  %p912_p9 = scmp.lt.s32.totalorder %s910_s29, %s904_s9 }
  0x72   : > { %720 = vmatpush3.bf16.msra.mxu1 %v719_v29  ;;  %v728_v38 = vpack.c.bf16 %v382_v37, %v381_v36  ;;  %v384_v40 = vld [vmem:[#allocation7 + $0x48] sm:$0xff]  ;;  %v385_v42 = vld [vmem:[#allocation7 + $0x50] sm:$0xff]  ;;  %v386_v43 = vld [vmem:[#allocation7 + $0x58] sm:$0xff] }
  0x73   : > { %721 = vmatprep.subr.bf16.mxu1 %v981_v0  ;;  %v731_v41 = vpack.c.bf16 %v384_v40, %v383_v39  ;;  %v734_v44 = vpack.c.bf16 %v386_v43, %v385_v42  ;;  %v387_v45 = vld [vmem:[#allocation7 + $0x60] sm:$0xff]  ;;  %v388_v46 = vld [vmem:[#allocation7 + $0x68] sm:$0xff]  ;;  %v389_v48 = vld [vmem:[#allocation7 + $0x70] sm:$0xff]  ;;  %p913_p12 = por %p912_p9, %p911_p7 }
  0x74   : > { %702 = vmatpush3.bf16.msra.mxu0 %v701_v10  ;;  %v737_v47 = vpack.c.bf16 %v388_v46, %v387_v45  ;;  %v390_v49 = vld [vmem:[#allocation7 + $0x78] sm:$0xff]  ;;  %v584_v51 = vld [vmem:[%s1275_s2] ss:$0 sm:$0xff] }
  0x75   : > { %703 = vmatprep.subr.bf16.mxu0 %v981_v0  ;;  %v740_v50 = vpack.c.bf16 %v390_v49, %v389_v48  ;;  %v585_v2 = vld [vmem:[%s1277_s4] ss:$0 sm:$0xff]  ;;  %p914_p2 = pnand %p913_p12, %p907_p3 }
  0x76   : > { %723 = vmatpush3.bf16.msra.mxu1 %v722_v32 }
  0x77   : > { %724 = vmatprep.subr.bf16.mxu1 %v981_v0 }
  0x78   : > { %705 = vmatpush3.bf16.msra.mxu0 %v704_v13 }
  0x79   : > { %706 = vmatprep.subr.bf16.mxu0 %v981_v0 }
  0x7a   : > { %726 = vmatpush3.bf16.msra.mxu1 %v725_v35 }
  0x7b   : > { %727 = vmatprep.subr.bf16.mxu1 %v981_v0 }
  0x7c   : > { %708 = vmatpush3.bf16.msra.mxu0 %v707_v16 }
  0x7d   : > { %709 = vmatprep.subr.bf16.mxu0 %v981_v0 }
  0x7e   : > { %729 = vmatpush3.bf16.msra.mxu1 %v728_v38 }
  0x7f   : > { %730 = vmatprep.subr.bf16.mxu1 %v981_v0 }
  0x80   : > { %711 = vmatpush3.bf16.msra.mxu0 %v710_v19 }
  0x81   : > { %712 = vmatprep.subr.bf16.mxu0 %v981_v0 }
  0x82   : > { %732 = vmatpush3.bf16.msra.mxu1 %v731_v41 }
  0x83   : > { %733 = vmatprep.subr.bf16.mxu1 %v981_v0 }
  0x84   : > { %714 = vmatpush3.bf16.msra.mxu0 %v713_v22 }
  0x85   : > { %715 = vmatprep.subr.bf16.mxu0 %v981_v0 }
  0x86   : > { %735 = vmatpush3.bf16.msra.mxu1 %v734_v44 }
  0x87   : > { %736 = vmatprep.subr.bf16.mxu1 %v981_v0 }
  0x88   : > { %717 = vmatpush3.bf16.msra.mxu0 %v716_v25 }
  0x8a   : > { %738 = vmatpush3.bf16.msra.mxu1 %v737_v47 }
  0x8b   : > { %657 = vmatmul.mubr.f32.vlgmr.msra.gmra.mrb[0].mxu0 %v269_v26  ;;  %739 = vmatprep.subr.bf16.mxu1 %v981_v0 }
  0x8e   : > { %741 = vmatpush3.bf16.msra.mxu1 %v740_v50 }
 0x15e   : > { %v359_v52 = vpop.f32.mrb[0].mxu0 }
 0x15f   : > { %v360_v53 = vadd.f32 %v584_v51, %v359_v52  ;;  %v658_v54 = vpop.f32.mrb[1].mxu0 }
 0x161   : > { %v363_v55 = vmin.f32 %v360_v53, 20.0  ;;  %vm372_vm1 = vcmp.gt.f32.partialorder %v360_v53, 20.0 }
 0x163   : > { %v364_v56 = vmul.f32 1.442695, %v363_v55 }
 0x165   : > { %814 = vpow2.f32 %v364_v56 }
 0x16f   : > { %v815_v57 = vpop.eup %814 }
 0x170   : > { %v366_v58 = vmul.f32 %v815_v57, %v815_v57  ;;  %v367_v59 = vmul.f32 2.0, %v815_v57 }
 0x172   : > { %v368_v60 = vadd.f32 %v367_v59, %v366_v58 }
 0x174   : > { %v369_v61 = vadd.f32 2.0, %v368_v60 }
 0x176   : > { %816 = vrcp.f32 %v369_v61 }
 0x180   : > { %v817_v62 = vpop.eup %816 }
 0x181   : > { %v371_v63 = vmul.f32 %v817_v62, %v368_v60 }
 0x183   : > { %v373_v0 = vsel %vm372_vm1, 1.0, %v371_v63 }
 0x184   : > { %v374_v1 = vmul.f32 %v373_v0, %v360_v53 }
 0x186   : > { %692 = vmatmul.mubr.f32.vlgmr.msra.gmra.mrb[0].mxu1 %v374_v1 }
 0x259   : > { %v464_v3 = vpop.f32.mrb[0].mxu1 }
 0x25a   : > { %v465_v4 = vadd.f32 %v585_v2, %v464_v3  ;;  %v693_v5 = vpop.f32.mrb[1].mxu1 }
 0x25c   : > { %468 = vst [vmem:[%s268_s28] sm:$0xff] %v465_v4 }
 0x25d   : > { %917 = shalt.err (!%p914_p2)
}
 0x25e   : > { %s918_s12 = scalar_lea.hbm %s1229_s15, 128  ;;  %s922_s26 = scalar_lea.hbm %s1278_s5, 256 }
 0x25f   : > { %p919_p13 = scmp.ne.s32.totalorder %s1229_s15, %s918_s12  ;;  %p923_p4 = scmp.lt.u32.totalorder %s1229_s15, %s1278_s5 }
 0x260   : > { %p924_p5 = scmp.lt.u32.totalorder %s922_s26, %s918_s12  ;;  %p926_p11 = scmp.lt.u32.totalorder %s918_s12, %s1229_s15 }
 0x261   : > { %p920_p6 = pnand %p919_p13, %p1292_p0 }
 0x262   : > { %p925_p8 = por %p924_p5, %p923_p4 }
 0x263   : > { %p921_p10 = pneg %p920_p6 }
 0x264   : > { %p927_p1 = por %p926_p11, %p925_p8 }
 0x266   : > { %p928_p3 = pnand %p927_p1, %p921_p10 }
 0x268   : > { %931 = shalt.err (!%p928_p3)
}
 0x269   : > { %752 = dma.vmem_to_hbm [thread:$0]  (%p1292_p0), %s1231_s7, 128, %s1229_s15, %s470_s16  }
 0x26a PF: > { %s495_s11 = sand.u32 1, %s962_s18   ;;  %p1293_p7 = scmp.ne.s32.totalorder %s1283_s25, 0 }
 0x26b   : > { %p1294_p9 = scmp.ge.s32.totalorder %s974_s21, 2  ;;  %s496_s28 = scalar_lea.sflag [#allocation4], %s495_s11 }
 0x26d   : > { %p766_p12 = pnand %p1294_p9, %p1293_p7 }
 0x26f   : > { %957 = dma.done.wait (!%p766_p12), %s496_s28, 128  }
 0x270   : > { %959 = vsyncadd (!%p766_p12), %s496_s28, 4294967168  ;;  %p19_p2 = scmp.ge.s32.totalorder %s1125_s14, 4   ;;  %s1295_s18 = smov %s966_s19 }
 0x271   : > { %s1296_s19 = smov %s970_s20  ;;  %s1297_s20 = smov %s1141_s27 }
 0x272   : > { %s1298_s21 = smov %s1125_s14  ;;  %21 = sbr.rel (!%p19_p2) target bundleno = 6 (0x6), region = 93 }
 0x279   :  { %501 = vsyncpa [#allocation3], 1 }
 0x27a   :  { %503 = vsyncpa [#allocation3 + $0x1], 1 }
 0x27b   :  { %504 = vsyncpa [#allocation6], 1 }
 0x27c   :  { %505 = vsyncpa [#allocation4], 1 }
 0x27d   :  { %507 = vsyncpa [#allocation4 + $0x1], 1 }

</bundles_post_ra>
